<compile_context>
chip_gen: v6e
topology: v6e:2x2x1
jax: 0.10.0
libtpu: 0.0.40
codegen_flags: <defaults>
</compile_context>

<pallas_src>
import math

import jax
import jax.numpy as jnp
from jax.experimental import pallas as pl
from jax.experimental.pallas import tpu as pltpu


# ----------------------------- Pallas kernels ------------------------------ #
def _torgb_kernel(wmod_ref, bias_ref, x_ref, o_ref):
    # wmod_ref : (3, C)        per-batch modulated conv weight (x dtype)
    # bias_ref : (3, 1)        output bias (f32)
    # x_ref    : (C, HW_TILE)  feature-map tile, native dtype (fed straight to MXU)
    # o_ref    : (3, HW_TILE)  RGB output tile
    out = jnp.dot(wmod_ref[...], x_ref[...],
                  preferred_element_type=jnp.float32)               # (3, HW_TILE) f32 acc
    o_ref[...] = (out + bias_ref[...]).astype(o_ref.dtype)


def _torgb_skip_kernel(wmod_ref, bias_ref, x_ref, skip_ref, o_ref):
    # Same as above with the (pre-upsampled) skip fused into the store (f32 add).
    out = jnp.dot(wmod_ref[...], x_ref[...],
                  preferred_element_type=jnp.float32)
    out = out + bias_ref[...] + skip_ref[...].astype(jnp.float32)
    o_ref[...] = out.astype(o_ref.dtype)


# ------------------------- generation-aware sizing ------------------------- #
def _tpu_vmem_info():
    """(vmem_capacity_bytes, looks_like_v7x). Falls back to v6e-like defaults."""
    try:
        info = pltpu.get_tpu_info()
        vmem = int(getattr(info, "vmem_capacity_bytes", 128 << 20))
    except Exception:
        vmem = 128 << 20
    # v7x: 64 MiB VMEM per TensorCore and 2 TCs per chip; v5e/v6e: 128 MiB, 1 TC.
    two_cores = vmem <= (96 << 20)
    return vmem, two_cores


def _choose_hw_tile(HW, C, x_bytes, extra_bytes_per_lane, scratch_per_lane, budget_bytes):
    """Largest multiple-of-128 divisor of HW whose buffered tiles fit the budget."""
    if HW % 128 != 0:
        return HW  # full-extent block (tiny spatial dims)
    per_lane = 2 * (C * x_bytes + extra_bytes_per_lane) + scratch_per_lane  # 2x: double-buffering
    cap = max(128, (budget_bytes // max(per_lane, 1)) // 128 * 128)
    cap = min(cap, 32768)
    tile, t = 128, 128
    limit = min(HW, cap)
    while t <= limit:
        if HW % t == 0:
            tile = t
        t += 128
    return tile


def torgb_conv_pallas(x, style, mod_weight, mod_bias, conv_weight, out_bias,
                      skip_up=None):
    """Modulated 1x1 conv (demodulate=False) + bias (+ fused skip add)."""
    B, C, H, W = x.shape
    S = style.shape[1]
    HW = H * W
    out_dtype = x.dtype
    x_bytes = jnp.dtype(x.dtype).itemsize
    out_bytes = jnp.dtype(out_dtype).itemsize

    scale_conv = 1.0 / math.sqrt(C * 1 * 1)   # fan_in = C * k * k, k = 1
    scale_mod = 1.0 / math.sqrt(S)            # EqualLinear scale, lr_mul = 1

    # Style modulation + weight modulation precomputed in plain JAX (O(B*3*C), trivial).
    s = (style.astype(jnp.float32) @ (mod_weight.astype(jnp.float32) * scale_mod).T
         + mod_bias.astype(jnp.float32).reshape(1, C))                        # (B, C)
    convw = conv_weight[0, :, :, 0, 0].astype(jnp.float32) * scale_conv       # (3, C)
    # Cast wmod to x dtype so the MXU consumes bf16 (or f32) directly — no in-kernel cast of x.
    wmod = (convw[None, :, :] * s[:, None, :]).astype(x.dtype)                # (B, 3, C)
    bias2d = out_bias.reshape(3, 1).astype(jnp.float32)                       # (3, 1)

    x2 = x.reshape(B, C, HW)          # native dtype — no wrapper astype round-trip

    has_skip = skip_up is not None
    skip_bytes = 0
    if has_skip:
        # Emit the skip in the output dtype: halves its HBM read for bf16 pipelines.
        skip2 = skip_up.astype(out_dtype).reshape(B, 3, HW)
        skip_bytes = jnp.dtype(skip2.dtype).itemsize

    _, two_cores = _tpu_vmem_info()
    if two_cores:                       # v7x-like: 64 MiB per TC, 32 MiB scoped default
        vmem_limit = 48 << 20
        budget = 22 << 20
    else:                               # v5e / v6e: 128 MiB physical VMEM
        vmem_limit = 64 << 20
        budget = 48 << 20

    extra_per_lane = 3 * out_bytes + (3 * skip_bytes if has_skip else 0)
    # f32 temporaries (matmul result, f32 skip upcast) are live once, not double-buffered.
    scratch_per_lane = 3 * 4 * (2 if has_skip else 1)
    hw_tile = _choose_hw_tile(HW, C, x_bytes, extra_per_lane, scratch_per_lane, budget)
    n_hw = HW // hw_tile

    # v7x: make sure both TensorCores get work on the "parallel" axes.
    if two_cores and B * n_hw < 2 and HW % 256 == 0:
        hw_tile = HW // 2
        n_hw = 2

    in_specs = [
        pl.BlockSpec((pl.Squeezed(), 3, C), lambda b, t: (b, 0, 0)),          # wmod
        pl.BlockSpec((3, 1), lambda b, t: (0, 0)),                            # bias
        pl.BlockSpec((pl.Squeezed(), C, hw_tile), lambda b, t: (b, 0, t)),    # x tile
    ]
    args = [wmod, bias2d, x2]
    kernel = _torgb_kernel
    if has_skip:
        in_specs.append(
            pl.BlockSpec((pl.Squeezed(), 3, hw_tile), lambda b, t: (b, 0, t)))
        args.append(skip2)
        kernel = _torgb_skip_kernel

    bytes_accessed = (B * C * HW * x_bytes
                      + B * 3 * HW * out_bytes
                      + B * 3 * C * x_bytes + 3 * 4)
    if has_skip:
        bytes_accessed += B * 3 * HW * skip_bytes

    out = pl.pallas_call(
        kernel,
        out_shape=jax.ShapeDtypeStruct((B, 3, HW), out_dtype),
        grid_spec=pltpu.PrefetchScalarGridSpec(
            num_scalar_prefetch=0,
            grid=(B, n_hw),
            in_specs=in_specs,
            out_specs=pl.BlockSpec((pl.Squeezed(), 3, hw_tile),
                                   lambda b, t: (b, 0, t)),
        ),
        compiler_params=pltpu.CompilerParams(
            dimension_semantics=("parallel", "parallel"),
            vmem_limit_bytes=int(vmem_limit)),
        cost_estimate=pl.CostEstimate(
            flops=2 * B * 3 * C * HW,
            transcendentals=0,
            bytes_accessed=int(bytes_accessed)),
    )(*args)

    return out.reshape(B, 3, H, W)


# --------------------- Upsample (upfirdn2d) skip path ---------------------- #
def make_blur_kernel(k=(1.0, 3.0, 3.0, 1.0), factor=2):
    k = jnp.asarray(k, jnp.float32)
    k = k[None, :] * k[:, None]
    k = k / jnp.sum(k)
    return k * (factor ** 2)


def upsample_blur(x, blur_kernel, factor=2):
    # TODO(synk): upfirdn2d (up=2, blur=[1,3,3,1]) skip upsampling left in plain JAX;
    # its result is consumed (added) inside the Pallas kernel.
    B, C, H, W = x.shape
    kh = blur_kernel.shape[0]
    p = kh - factor
    pad0 = (p + 1) // 2 + factor - 1
    pad1 = p // 2
    k = jnp.flip(blur_kernel, (0, 1))
    w = jnp.broadcast_to(k[None, None], (C, 1, kh, kh)).astype(jnp.float32)
    # lhs_dilation=2 yields length 2H-1; +1 trailing pad matches the zero-stuffed
    # length-2H signal of upfirdn2d(up=2, pad=(pad0, pad1)).
    return jax.lax.conv_general_dilated(
        x.astype(jnp.float32), w,
        window_strides=(1, 1),
        padding=((pad0, pad1 + 1), (pad0, pad1 + 1)),
        lhs_dilation=(factor, factor),
        dimension_numbers=("NCHW", "OIHW", "NCHW"),
        feature_group_count=C)


def upfirdn2d_reference(x, kernel, up=2, pad=(2, 1)):
    """Literal zero-stuff + pad + (flipped-kernel) conv, mirroring upfirdn2d_native."""
    B, C, H, W = x.shape
    x = x.astype(jnp.float32)
    x_up = jnp.zeros((B, C, H * up, W * up), jnp.float32)
    x_up = x_up.at[:, :, ::up, ::up].set(x)
    pad0, pad1 = pad
    x_pad = jnp.pad(x_up, ((0, 0), (0, 0), (pad0, pad1), (pad0, pad1)))
    kh, kw = kernel.shape
    w = jnp.broadcast_to(jnp.flip(kernel, (0, 1))[None, None],
                         (C, 1, kh, kw)).astype(jnp.float32)
    return jax.lax.conv_general_dilated(
        x_pad, w, (1, 1), "VALID",
        dimension_numbers=("NCHW", "OIHW", "NCHW"), feature_group_count=C)


def to_rgb_forward(x, style, params, skip=None):
    skip_up = None
    if skip is not None:
        skip_up = upsample_blur(skip, params["blur_kernel"])
    return torgb_conv_pallas(x, style, params["mod_weight"], params["mod_bias"],
                             params["conv_weight"], params["bias"], skip_up=skip_up)


# ------------------------------- reference -------------------------------- #
def to_rgb_reference(x, style, params, skip=None):
    B, C, H, W = x.shape
    S = style.shape[1]
    s = style @ (params["mod_weight"] / math.sqrt(S)).T + params["mod_bias"]  # (B, C)
    w = params["conv_weight"][0, :, :, 0, 0] / math.sqrt(C)                   # (3, C)
    wmod = w[None] * s[:, None, :]                                            # (B, 3, C)
    out = jnp.einsum("boc,bchw->bohw", wmod, x.astype(jnp.float32)) + params["bias"]
    if skip is not None:
        # cross-check: zero-stuffing upfirdn2d, distinct from the forward-path impl
        out = out + upfirdn2d_reference(skip, params["blur_kernel"], up=2, pad=(2, 1))
    return out


# --------------------------------- main ------------------------------------ #
if __name__ == "__main__":
    B, C, S, H, W = 2, 16, 32, 16, 16

    key = jax.random.PRNGKey(0)
    k_x, k_style, k_modw, k_convw, k_skip = jax.random.split(key, 5)

    params = {
        "mod_weight": jax.random.normal(k_modw, (C, S), jnp.float32),        # EqualLinear weight
        "mod_bias": jnp.ones((C,), jnp.float32),                             # bias_init=1
        "conv_weight": jax.random.normal(k_convw, (1, 3, C, 1, 1), jnp.float32),
        "bias": jnp.zeros((1, 3, 1, 1), jnp.float32),
        "blur_kernel": make_blur_kernel(),
    }

    x = jax.random.normal(k_x, (B, C, H, W), jnp.float32)
    style = jax.random.normal(k_style, (B, S), jnp.float32)
    skip = jax.random.normal(k_skip, (B, 3, H // 2, W // 2), jnp.float32)

    # no-skip path (f32)
    out = to_rgb_forward(x, style, params)
    jax.block_until_ready(out)
    ref = to_rgb_reference(x, style, params)
    assert out.shape == (B, 3, H, W)
    assert jnp.allclose(out, ref, rtol=1e-2, atol=1e-2), "mismatch (no skip)"

    # skip path (Upsample + fused add), cross-checked vs zero-stuffing upfirdn2d ref
    out_s = to_rgb_forward(x, style, params, skip=skip)
    jax.block_until_ready(out_s)
    ref_s = to_rgb_reference(x, style, params, skip=skip)
    assert jnp.allclose(out_s, ref_s, rtol=1e-2, atol=1e-2), "mismatch (skip)"

    # native-dtype path: x in bf16 fed straight to the MXU (wmod cast to bf16 in wrapper)
    out_bf = to_rgb_forward(x.astype(jnp.bfloat16), style, params)
    jax.block_until_ready(out_bf)
    assert out_bf.dtype == jnp.bfloat16
    assert jnp.allclose(out_bf.astype(jnp.float32), ref, rtol=1e-1, atol=2e-1), \
        "mismatch (bf16 x)"

    # bf16 x + skip: skip is emitted in bf16 (out dtype) and added in f32 in-kernel
    out_bfs = to_rgb_forward(x.astype(jnp.bfloat16), style, params, skip=skip)
    jax.block_until_ready(out_bfs)
    assert out_bfs.dtype == jnp.bfloat16
    assert jnp.allclose(out_bfs.astype(jnp.float32), ref_s, rtol=1e-1, atol=2e-1), \
        "mismatch (bf16 x + skip)"

    print("KERNEL_OK")
</pallas_src>

<mosaic_0001>
module attributes {stable_mosaic.version = 11 : i64} {
  func.func @_torgb_kernel(%arg0: i32, %arg1: i32, %arg2: memref<1x3x16xf32, #tpu.memory_space<vmem>>, %arg3: memref<3x1xf32, #tpu.memory_space<vmem>>, %arg4: memref<1x16x256xf32, #tpu.memory_space<vmem>>, %arg5: memref<1x3x256xf32, #tpu.memory_space<vmem>>) attributes {dimension_semantics = [#tpu.dimension_semantics<parallel>, #tpu.dimension_semantics<parallel>], iteration_bounds = array<i64: 2, 1>, scalar_prefetch = 0 : i64, scratch_operands = 0 : i64, tpu.core_type = #tpu.core_type<tc>, window_params = [{transform_indices = @transform_0, window_bounds = array<i64: 1, 3, 16>}, {pipeline_mode = #tpu.pipeline_mode<synchronous>, transform_indices = @transform_1, window_bounds = array<i64: 3, 1>}, {transform_indices = @transform_2, window_bounds = array<i64: 1, 16, 256>}, {transform_indices = @transform_3, window_bounds = array<i64: 1, 3, 256>}]} {
    %c0 = arith.constant 0 : index
    %c0_0 = arith.constant 0 : index
    %c0_1 = arith.constant 0 : index
    %0 = vector.load %arg2[%c0, %c0_0, %c0_1] : memref<1x3x16xf32, #tpu.memory_space<vmem>>, vector<1x3x16xf32>
    %1 = vector.shape_cast %0 : vector<1x3x16xf32> to vector<3x16xf32>
    %c0_2 = arith.constant 0 : index
    %c0_3 = arith.constant 0 : index
    %c0_4 = arith.constant 0 : index
    %2 = vector.load %arg4[%c0_2, %c0_3, %c0_4] : memref<1x16x256xf32, #tpu.memory_space<vmem>>, vector<1x16x256xf32>
    %3 = vector.shape_cast %2 : vector<1x16x256xf32> to vector<16x256xf32>
    %cst = arith.constant dense<0.000000e+00> : vector<3x256xf32>
    %4 = tpu.matmul %1, %3, %cst {dimension_numbers = #tpu.dot_dimension_numbers<[1], [0], [0], [1], [0, 0, 1, 1], [], []>} : vector<3x16xf32>, vector<16x256xf32>, vector<3x256xf32> -> vector<3x256xf32>
    %c0_5 = arith.constant 0 : index
    %c0_6 = arith.constant 0 : index
    %5 = vector.load %arg3[%c0_5, %c0_6] : memref<3x1xf32, #tpu.memory_space<vmem>>, vector<3x1xf32>
    %6 = vector.broadcast %5 : vector<3x1xf32> to vector<3x256xf32>
    %7 = arith.addf %4, %6 : vector<3x256xf32>
    %c0_7 = arith.constant 0 : index
    %c0_8 = arith.constant 0 : index
    %c0_9 = arith.constant 0 : index
    %8 = vector.load %arg5[%c0_7, %c0_8, %c0_9] : memref<1x3x256xf32, #tpu.memory_space<vmem>>, vector<1x3x256xf32>
    %9 = vector.shape_cast %8 : vector<1x3x256xf32> to vector<3x256xf32>
    %10 = vector.shape_cast %7 : vector<3x256xf32> to vector<1x3x256xf32>
    tpu.vector_store %arg5[%c0_7, %c0_8, %c0_9], %10 {strides = array<i32>} : memref<1x3x256xf32, #tpu.memory_space<vmem>>, vector<1x3x256xf32>,
    return
  }
  func.func @transform_0(%arg0: i32, %arg1: i32) -> (i32, i32, i32) {
    %c0_i32 = arith.constant 0 : i32
    %c0_i32_0 = arith.constant 0 : i32
    %c0_i32_1 = arith.constant 0 : i32
    return %arg0, %c0_i32, %c0_i32_0 : i32, i32, i32
  }
  func.func @transform_1(%arg0: i32, %arg1: i32) -> (i32, i32) {
    %c0_i32 = arith.constant 0 : i32
    %c0_i32_0 = arith.constant 0 : i32
    %c0_i32_1 = arith.constant 0 : i32
    return %c0_i32, %c0_i32_0 : i32, i32
  }
  func.func @transform_2(%arg0: i32, %arg1: i32) -> (i32, i32, i32) {
    %c0_i32 = arith.constant 0 : i32
    %c0_i32_0 = arith.constant 0 : i32
    return %arg0, %c0_i32, %arg1 : i32, i32, i32
  }
  func.func @transform_3(%arg0: i32, %arg1: i32) -> (i32, i32, i32) {
    %c0_i32 = arith.constant 0 : i32
    %c0_i32_0 = arith.constant 0 : i32
    return %arg0, %c0_i32, %arg1 : i32, i32, i32
  }
}

</mosaic_0001>

<bundles_post_ra>
// kernel: tpu_custom_call.1
= control target key start
LH: loop header
LB: loop body
LE: loop exit
PB: predicated region body
PF: predicated region fallthrough
CT: control target
= control target key end

     0   :  { %8 = vsyncpa [#allocation3], 0  ;;  %s718_s0 = inlined_call_operand.vmem [shape: f32[2,3,16], index: 0, kind: input, shape index: {}]   ;;  %s719_s1 = inlined_call_operand.vmem [shape: f32[3,1], index: 1, kind: input, shape index: {}]   ;;  %s720_s2 = inlined_call_operand.hbm [shape: f32[2,16,256], index: 2, kind: input, shape index: {}]   ;;  %s721_s3 = inlined_call_operand.vmem [shape: f32[2,3,256], index: 3, kind: output, shape index: {}]  }
   0x1   :  { %10 = vsyncpa [#allocation3 + $0x1], 0  ;;  %s616_s12 = smov 0   ;;  %s618_s13 = smov 0  }
   0x2   :  { %s620_s14 = smov 0   ;;  %s622_s15 = smov 0  }
   0x3   :  { %s624_s16 = smov 0   ;;  %s626_s17 = smov 0  }
   0x4 LB: > { %s434_s18 = sadd.s32 4294967295, %s589_s17   ;;  %s28_s19 = sadd.s32 1, %s585_s16  ;;  %s589_s17 = sphi %s626_s17, %s16_s17   ;;  %s585_s16 = sphi %s624_s16, %s729_s16   ;;  %s581_s15 = sphi %s622_s15, %s728_s15   ;;  %s577_s14 = sphi %s620_s14, %s727_s14   ;;  %s573_s13 = sphi %s618_s13, %s726_s13   ;;  %s569_s12 = sphi %s616_s12, %s725_s12  }
   0x5   : > { %p30_p0 = scmp.ge.s32.totalorder %s28_s19, 2  ;;  %s84_s20 = sadd.s32 1, %s577_s14 }
   0x6   : > { %p91_p1 = scmp.ne.s32.totalorder %s577_s14, %s573_s13  ;;  %p92_p2 = scmp.eq.s32.totalorder %s589_s17, 0 }
   0x7   : > { %s731_s19 = smov (%p30_p0, %s28_s19), 0  ;;  %p97_p4 = scmp.ne.s32.totalorder %s573_s13, %s569_s12 }
   0x8   : > { %p652_p3 = por %p92_p2, %p91_p1  ;;  %s79_s22 = ssub.s32 %s585_s16, %s731_s19 }
   0x9   : > { %p98_p5 = scmp.eq.s32.totalorder %s434_s18, 0  ;;  %p82_p6 = scmp.eq.s32.totalorder %s79_s22, 0 }
   0xa   : > { %p457_p8 = scmp.lt.s32.totalorder %s589_s17, 2  ;;  %s159_s25 = sand.u32 1, %s577_s14  }
   0xb   : > { %p659_p7 = por %p98_p5, %p97_p4  ;;  %s449_s26 = sshll.u32 %s585_s16, 9 }
   0xc   : > { %s665_s24 = scalar_select %p82_p6, %s577_s14, %s84_s20  }
   0xd   : > { %s438_s27 = sshll.u32 %s159_s25, 5  ;;  %s171_s30 = scalar_lea.hbm %s720_s2, %s449_s26 }
   0xe   : > { %s163_s4 = scalar_lea.vmem [#allocation2], %s438_s27  ;;  %p674_p9 = pnand %p457_p8, %p652_p3 }
   0xf   : > { %s172_s5 = sshll.u32 %s163_s4, 4  ;;  %s160_s7 = scalar_lea.sflag [#allocation3], %s159_s25  ;;  %s173_s5 = int_to_ptr.vmem [resolvable:$true] %s172_s5 }
  0x10   : > { %p513_p10 = pneg %p674_p9  ;;  %s524_s8 = scalar_lea.vmem %s173_s5, 512 }
  0x11   : > { %p525_p11 = scmp.ne.s32.totalorder %s173_s5, %s524_s8  ;;  %s591_s9 = smov [#allocation2]  }
  0x12   : > { %s529_s10 = sshll.u32 %s591_s9, 4  ;;  %s530_s10 = int_to_ptr.vmem [resolvable:$false] %s529_s10 }
  0x13   : > { %p527_p12 = pnand %p525_p11, %p513_p10  ;;  %s531_s11 = scalar_lea.vmem %s530_s10, 1024 }
  0x14   : > { %p532_p0 = scmp.lt.s32.totalorder %s173_s5, %s530_s10  ;;  %p533_p1 = scmp.lt.s32.totalorder %s531_s11, %s524_s8 }
  0x15   : > { %p528_p13 = pneg %p527_p12 }
  0x16   : > { %p534_p2 = por %p533_p1, %p532_p0 }
  0x18   : > { %p535_p3 = pnand %p534_p2, %p528_p13 }
  0x1a   : > { %538 = shalt.err (!%p535_p3)
}
  0x1b   : > { %s592_s12 = smov 256   ;;  %s593_s18 = smov 16  }
  0x1c   : > { %456 = dma.hbm_to_vmem [thread:$0]  (!%p674_p9), %s171_s30, 512, %s173_s5, %s160_s7, %s592_s12, %s592_s12, %s593_s18  }
  0x1d   : > { %p441_p4 = scmp.ge.s32.totalorder %s589_s17, 1  ;;  %p180_p5 = scmp.lt.s32.totalorder %s589_s17, 3 }
  0x1f   : > { %p181_p6 = pnand %p441_p4, %p180_p5 }
  0x20   : > { %s186_s20 = sand.u32 (!%p181_p6), 1, %s573_s13  }
  0x21   : > { %184 = sbr.rel (%p181_p6) target bundleno = 245 (0xf5), region = 32  ;;  %s442_s21 = sshll.u32 (!%p181_p6), %s186_s20, 5 }
  0x22   : > { %s187_s22 = scalar_lea.sflag (!%p181_p6), [#allocation3], %s186_s20  ;;  %s190_s25 = scalar_lea.vmem (!%p181_p6), [#allocation2], %s442_s21 }
  0x26   : > { %564 = dma.done.wait (%p659_p7), %s187_s22, 512  }
  0x27   : > { %566 = vsyncadd (%p659_p7), %s187_s22, 4294966784  ;;  %p221_p8 = scmp.lt.s32.totalorder %s581_s15, 1  ;;  %v594_v0 = vmov 0.0   ;;  %v595_v1 = vmov 0   ;;  %v240_v2 = vld [vmem:[%s190_s25 + $0x18] sm:$0xff]  ;;  %v239_v3 = vld [vmem:[%s190_s25 + $0x10] sm:$0xff] }
  0x28   : > { %315 = vmatprep.mubr.f32.mxu0 %v594_v0  ;;  %510 = vset.pattern.permute.xlu0 %v595_v1  ;;  %v238_v4 = vld [vmem:[%s190_s25 + $0x8] sm:$0xff]  ;;  %v237_v5 = vld [vmem:[%s190_s25] sm:$0xff]  ;;  %vm247_vm0 = vcmask 130048  }
  0x29   : > { %s733_s15 = smov (!%p221_p8, %s581_s15), 1  ;;  %279 = vmatprep.subr.mxu0 %v240_v2  ;;  %v241_v6 = vld [vmem:[%s719_s1] sm:$0x7] }
  0x2a   : > { %s443_s26 = sshll.u32 %s733_s15, 2  ;;  %280 = vmatpush1.msra.mxu0 %v239_v3  ;;  %244 = vperm.xlu0 %510, %v241_v6   ;;  %s450_s4 = sshll.u32 %s733_s15, 3 }
  0x2b   : > { %s224_s29 = scalar_lea.vmem %s718_s0, %s443_s26  ;;  %281 = vmatprep.subr.mxu0 %v238_v4  ;;  %s234_s7 = scalar_lea.vmem %s721_s3, %s450_s4 }
  0x2c   : > { %v236_v7 = vld [vmem:[%s224_s29] sm:$0x7]  ;;  %282 = vmatpush1.msra.mxu0 %v237_v5 }
  0x2d   : > { %446 = vmatmul.mubr.msk.f32.vlgmr.msra.gmra.mxu0 %vm247_vm0, %v236_v7 }
  0xa5   : > { %v245_v8 = vpop.permute.xlu0 %244 }
  0xed   : > { %v317_v9 = vpop.f32.mrf.mxu0 }
  0xee   : > { %v318_v11 = vadd.f32 %v317_v9, %v245_v8 }
  0xef   : > { %v319_v10 = vpop.f32.mrf.mxu0 }
  0xf0   : > { %v320_v12 = vadd.f32 %v319_v10, %v245_v8 }
  0xf2   : > { %v324_v13 = vcombine.low %v318_v11, %v320_v12 }
  0xf4   : > { %326 = vst [vmem:[%s234_s7] sm:$0x77] %v324_v13 }
  0xf5 PF: > { %s16_s17 = sadd.s32 1, %s589_s17   ;;  %s725_s12 = smov %s573_s13 }
  0xf6   : > { %p13_p7 = scmp.ge.s32.totalorder %s16_s17, 4   ;;  %s726_s13 = smov %s577_s14 }
  0xf7   : > { %s727_s14 = smov %s665_s24  ;;  %s728_s15 = smov %s585_s16 }
  0xf8   : > { %s729_s16 = smov %s731_s19  ;;  %15 = sbr.rel (!%p13_p7) target bundleno = 4 (0x4), region = 75 }
  0xfd   :  { %357 = vsyncpa [#allocation3], 1 }
  0xfe   :  { %359 = vsyncpa [#allocation3 + $0x1], 1 }

</bundles_post_ra>
